<compile_context>
chip_gen: v6e
topology: v6e:2x2x1
jax: 0.10.0
libtpu: 0.0.40
codegen_flags: <defaults>
</compile_context>

<pallas_src>
import jax
import jax.numpy as jnp
from jax.experimental import pallas as pl
from jax.experimental.pallas import tpu as pltpu

# Problem sizes implied by the module: input (3,4), mat2 (4,5), bias (3,5).
M, K, N = 3, 4, 5

_SMALL_VMEM_BUDGET = 2 * 1024 * 1024  # single-block cutoff (bytes, padded)


def _round_up(x, m):
    return (x + m - 1) // m * m


def _pick_tile(padded, target, align):
    """Largest multiple of `align` that is <= target and divides `padded`."""
    t = max(align, min(target, padded) // align * align)
    while padded % t:
        t -= align
    return t


def _device_kind():
    try:
        return jax.devices()[0].device_kind.lower()
    except Exception:
        return ""


def _vmem_capacity_bytes():
    try:
        return int(pltpu.get_tpu_info().vmem_capacity_bytes)
    except Exception:
        return 64 * 1024 * 1024  # assume the smallest (v7x) if query fails


def _tile_config():
    """Returns (tm, tn, tk, vmem_limit_bytes_or_None, two_tensorcores)."""
    kind = _device_kind()
    if "v6" in kind or "v7" in kind:
        # v6e: 128 MiB physical VMEM; v7x: 64 MiB and 2 TensorCores.
        # 512x512x1024 f32 tiles double-buffer to ~13 MiB -> fits both.
        vmem_limit = min(48 * 1024 * 1024, _vmem_capacity_bytes() * 3 // 4)
        return 512, 512, 1024, vmem_limit, ("v7" in kind)
    # v5e (16 MiB default scoped VMEM, 128x128 MXU) and unknown parts.
    return 256, 256, 512, None, False


# ---------------------------------------------------------------------------
# Small path: whole problem in one VMEM block, no grid, no wrapper pad/slice.
# ---------------------------------------------------------------------------
def _gemm_single_block_kernel(x_ref, w_ref, b_ref, o_ref):
    acc = jnp.dot(x_ref[...], w_ref[...], preferred_element_type=jnp.float32)
    o_ref[...] = (acc + b_ref[...].astype(jnp.float32)).astype(o_ref.dtype)


# ---------------------------------------------------------------------------
# Tiled path: accumulate straight into the k-invariant f32 output block.
# (Valid while the output dtype is f32; reinstate an f32 scratch accumulator
# if the output ever becomes bf16.)
# ---------------------------------------------------------------------------
def _make_tiled_kernel(compute_dtype):
    def kernel(x_ref, w_ref, b_ref, o_ref):
        @pl.when(pl.program_id(2) == 0)
        def _():
            o_ref[...] = b_ref[...].astype(o_ref.dtype)

        o_ref[...] += jnp.dot(
            x_ref[...].astype(compute_dtype),
            w_ref[...].astype(compute_dtype),
            preferred_element_type=jnp.float32,
        ).astype(o_ref.dtype)

    return kernel


def addmm(x, mat2, bias, *, use_bf16_mxu=False):
    """out = bias + x @ mat2  (alpha = beta = 1.0, as in the module)."""
    m, k = x.shape
    k2, n = mat2.shape
    assert k == k2 and bias.shape == (m, n)
    out_dtype = jnp.float32

    # VMEM footprint once Mosaic pads each Ref to (8,128) tiles.
    mp8, kp128, np128 = _round_up(m, 8), _round_up(k, 128), _round_up(n, 128)
    padded_bytes = 4 * (mp8 * kp128 + _round_up(k, 8) * np128 + 2 * mp8 * np128)

    if padded_bytes <= _SMALL_VMEM_BUDGET:
        # Launch/DMA-overhead bound: a single invocation, raw shapes in/out
        # (Mosaic handles sub-(8,128) shapes internally), no pad / no slice.
        return pl.pallas_call(
            _gemm_single_block_kernel,
            out_shape=jax.ShapeDtypeStruct((m, n), out_dtype),
            in_specs=[
                pl.BlockSpec(memory_space=pltpu.MemorySpace.VMEM),
                pl.BlockSpec(memory_space=pltpu.MemorySpace.VMEM),
                pl.BlockSpec(memory_space=pltpu.MemorySpace.VMEM),
            ],
            out_specs=pl.BlockSpec(memory_space=pltpu.MemorySpace.VMEM),
        )(x, mat2, bias)

    tm_t, tn_t, tk_t, vmem_limit, two_cores = _tile_config()

    # Pad only to (8,128) legality, then pick tiles that divide the padded
    # dims (avoids over-padding N/K to tile multiples and the wasted MXU
    # work / HBM traffic that comes with it).
    mp, kp, np_ = _round_up(m, 8), _round_up(k, 128), _round_up(n, 128)
    tm = _pick_tile(mp, tm_t, 8)
    tn = _pick_tile(np_, tn_t, 128)
    tk = _pick_tile(kp, tk_t, 128)

    # On 2-TensorCore parts (v7x) make sure the parallel (M,N) grid has >=2
    # blocks so the second core gets work.
    if two_cores and (mp // tm) * (np_ // tn) < 2:
        if np_ >= 256:
            tn = _pick_tile(np_, max(128, tn // 2), 128)
        elif mp >= 16:
            tm = _pick_tile(mp, max(8, tm // 2), 8)

    def _pad(a, rows, cols):
        r, c = a.shape
        if (r, c) == (rows, cols):
            return a  # skip the extra HBM pass when already aligned
        return jnp.pad(a, ((0, rows - r), (0, cols - c)))

    xp = _pad(x, mp, kp)
    wp = _pad(mat2, kp, np_)
    bp = _pad(bias, mp, np_)

    grid = (mp // tm, np_ // tn, kp // tk)
    compute_dtype = jnp.bfloat16 if use_bf16_mxu else jnp.float32

    cp_kwargs = dict(dimension_semantics=("parallel", "parallel", "arbitrary"))
    if vmem_limit is not None:
        cp_kwargs["vmem_limit_bytes"] = int(vmem_limit)

    out_p = pl.pallas_call(
        _make_tiled_kernel(compute_dtype),
        out_shape=jax.ShapeDtypeStruct((mp, np_), out_dtype),
        grid_spec=pltpu.PrefetchScalarGridSpec(
            num_scalar_prefetch=0,
            grid=grid,
            in_specs=[
                pl.BlockSpec((tm, tk), lambda i, j, kk: (i, kk)),
                pl.BlockSpec((tk, tn), lambda i, j, kk: (kk, j)),
                pl.BlockSpec((tm, tn), lambda i, j, kk: (i, j)),
            ],
            out_specs=pl.BlockSpec((tm, tn), lambda i, j, kk: (i, j)),
        ),
        compiler_params=pltpu.CompilerParams(**cp_kwargs),
    )(xp, wp, bp)

    if (mp, np_) == (m, n):
        return out_p
    return out_p[:m, :n]


if __name__ == "__main__":
    key = jax.random.PRNGKey(0)
    kx, kw, kb = jax.random.split(key, 3)

    # Deterministic "parameters" (module used torch.randn at init).
    x = jax.random.normal(kx, (M, K), dtype=jnp.float32)     # input
    mat2 = jax.random.normal(kw, (K, N), dtype=jnp.float32)  # self.mat2
    bias = jax.random.normal(kb, (M, N), dtype=jnp.float32)  # self.bias

    out = addmm(x, mat2, bias)
    jax.block_until_ready(out)

    # Sanity check against plain JAX reference (alpha = beta = 1.0).
    ref = bias + x @ mat2
    assert out.shape == (M, N)
    assert jnp.allclose(out, ref, atol=1e-5, rtol=1e-5)

    # Exercise the tiled/scaled path too (still deterministic, still checked).
    Ms, Ks, Ns = 512, 1024, 384
    kx2, kw2, kb2 = jax.random.split(jax.random.PRNGKey(1), 3)
    xs = jax.random.normal(kx2, (Ms, Ks), dtype=jnp.float32)
    ws = jax.random.normal(kw2, (Ks, Ns), dtype=jnp.float32)
    bs = jax.random.normal(kb2, (Ms, Ns), dtype=jnp.float32)
    outs = addmm(xs, ws, bs)
    jax.block_until_ready(outs)
    refs = bs + xs @ ws
    assert jnp.allclose(outs, refs, atol=1e-3, rtol=1e-3)

    print("KERNEL_OK")
</pallas_src>

<mosaic_0001>
module attributes {stable_mosaic.version = 11 : i64} {
  func.func @_gemm_single_block_kernel(%arg0: memref<3x4xf32, #tpu.memory_space<vmem>>, %arg1: memref<4x5xf32, #tpu.memory_space<vmem>>, %arg2: memref<3x5xf32, #tpu.memory_space<vmem>>, %arg3: memref<3x5xf32, #tpu.memory_space<vmem>>) attributes {dimension_semantics = [], scalar_prefetch = 0 : i64, scratch_operands = 0 : i64, tpu.core_type = #tpu.core_type<tc>} {
    %c0 = arith.constant 0 : index
    %c0_0 = arith.constant 0 : index
    %0 = vector.load %arg0[%c0, %c0_0] : memref<3x4xf32, #tpu.memory_space<vmem>>, vector<3x4xf32>
    %c0_1 = arith.constant 0 : index
    %c0_2 = arith.constant 0 : index
    %1 = vector.load %arg1[%c0_1, %c0_2] : memref<4x5xf32, #tpu.memory_space<vmem>>, vector<4x5xf32>
    %cst = arith.constant dense<0.000000e+00> : vector<3x5xf32>
    %2 = tpu.matmul %0, %1, %cst {dimension_numbers = #tpu.dot_dimension_numbers<[1], [0], [0], [1], [0, 0, 1, 1], [], []>} : vector<3x4xf32>, vector<4x5xf32>, vector<3x5xf32> -> vector<3x5xf32>
    %c0_3 = arith.constant 0 : index
    %c0_4 = arith.constant 0 : index
    %3 = vector.load %arg2[%c0_3, %c0_4] : memref<3x5xf32, #tpu.memory_space<vmem>>, vector<3x5xf32>
    %4 = arith.addf %2, %3 : vector<3x5xf32>
    %c0_5 = arith.constant 0 : index
    %c0_6 = arith.constant 0 : index
    %5 = vector.load %arg3[%c0_5, %c0_6] : memref<3x5xf32, #tpu.memory_space<vmem>>, vector<3x5xf32>
    tpu.vector_store %arg3[%c0_5, %c0_6], %4 {strides = array<i32>} : memref<3x5xf32, #tpu.memory_space<vmem>>, vector<3x5xf32>,
    return
  }
}

</mosaic_0001>

<bundles_post_ra>
// kernel: tpu_custom_call.1
= control target key start
LH: loop header
LB: loop body
LE: loop exit
PB: predicated region body
PF: predicated region fallthrough
CT: control target
= control target key end

     0   :  { %8 = vsyncpa [#allocation3], 0  ;;  %s288_s0 = inlined_call_operand.hbm [shape: f32[3,4], index: 0, kind: input, shape index: {}]   ;;  %s289_s1 = inlined_call_operand.hbm [shape: f32[4,5], index: 1, kind: input, shape index: {}]   ;;  %s290_s2 = inlined_call_operand.hbm [shape: f32[3,5], index: 2, kind: input, shape index: {}]   ;;  %s291_s3 = inlined_call_operand.hbm [shape: f32[3,5], index: 3, kind: output, shape index: {}]  }
   0x1   :  { %9 = vsyncpa [#allocation6], 0 }
   0x2   :  { %10 = vsyncpa [#allocation4], 0  ;;  %s250_s12 = smov [#allocation5]   ;;  %s251_s14 = smov [#allocation2]  }
   0x3   :  { %s27_s13 = sshll.u32 %s250_s12, 4  ;;  %s17_s15 = sshll.u32 %s251_s14, 4  ;;  %s28_s13 = int_to_ptr.vmem [resolvable:$true] %s27_s13  ;;  %s18_s15 = int_to_ptr.vmem [resolvable:$true] %s17_s15 }
   0x4   :  { %s172_s16 = scalar_lea.vmem %s28_s13, 64  ;;  %p177_p1 = scmp.lt.s32.totalorder %s28_s13, %s28_s13 }
   0x5   :  { %p173_p0 = scmp.ne.s32.totalorder %s28_s13, %s172_s16  ;;  %p178_p2 = scmp.lt.s32.totalorder %s172_s16, %s172_s16 }
   0x7   :  { %p179_p3 = por %p178_p2, %p177_p1 }
   0x9   :  { %p180_p4 = pnand %p179_p3, %p173_p0 }
   0xb   :  { %183 = shalt.err (!%p180_p4)
}
   0xc   :  { %30 = dma.hbm_to_vmem [thread:$0]  %s289_s1, 64, %s28_s13, [#allocation6]  }
   0xd   :  { %s192_s19 = scalar_lea.vmem %s18_s15, 64  ;;  %p197_p6 = scmp.lt.s32.totalorder %s18_s15, %s18_s15 }
   0xe   :  { %p193_p5 = scmp.ne.s32.totalorder %s18_s15, %s192_s19  ;;  %p198_p7 = scmp.lt.s32.totalorder %s192_s19, %s192_s19 }
  0x10   :  { %p199_p8 = por %p198_p7, %p197_p6 }
  0x12   :  { %p200_p9 = pnand %p199_p8, %p193_p5 }
  0x14   :  { %203 = shalt.err (!%p200_p9)
}
  0x15   :  { %20 = dma.hbm_to_vmem [thread:$0]  %s288_s0, 64, %s18_s15, [#allocation3]  }
  0x16   :  { %s252_s22 = smov [#allocation7]  }
  0x17   :  { %s37_s23 = sshll.u32 %s252_s22, 4  ;;  %s38_s23 = int_to_ptr.vmem [resolvable:$true] %s37_s23 }
  0x18   :  { %s212_s24 = scalar_lea.vmem %s38_s23, 64  ;;  %p217_p11 = scmp.lt.s32.totalorder %s38_s23, %s38_s23 }
  0x19   :  { %p213_p10 = scmp.ne.s32.totalorder %s38_s23, %s212_s24  ;;  %p218_p12 = scmp.lt.s32.totalorder %s212_s24, %s212_s24 }
  0x1b   :  { %p219_p13 = por %p218_p12, %p217_p11 }
  0x1d   :  { %p220_p0 = pnand %p219_p13, %p213_p10 }
  0x1f   :  { %223 = shalt.err (!%p220_p0)
}
  0x20   :  { %40 = dma.hbm_to_vmem [thread:$0]  %s290_s2, 64, %s38_s23, [#allocation6]  }
  0x21   :  { %244 = dma.done.wait [#allocation3], 64  }
  0x22   :  { %245 = vsyncadd [#allocation3], 4294967232 }
  0x23   :  { %246 = dma.done.wait [#allocation6], 128  }
  0x24   :  { %247 = vsyncadd [#allocation6], 4294967168  ;;  %v253_v0 = vmov 0.0   ;;  %vm254_vm0 = vmmov 0   ;;  %vm57_vm1 = vcmask 1043456   ;;  %vm53_vm2 = vcmask 31744  }
  0x25   :  { %153 = vmatprep.subr.mxu0 %v253_v0  ;;  %155 = vmatprep.mubr.msk.f32.mxu0 %vm254_vm0, %v253_v0  ;;  %v51_v1 = vld [vmem:[#allocation5] sm:$0xf]  ;;  %v50_v2 = vld [vmem:[#allocation2] sm:$0x7]  ;;  %v52_v3 = vld [vmem:[#allocation7] sm:$0x7] }
  0x26   :  { %154 = vmatpush3.msk.msra.mxu0 %vm57_vm1, %v51_v1  ;;  %s255_s0 = smov [#allocation8]   ;;  %vm131_vm3 = vcmask 34816  }
  0x27   :  { %156 = vmatmul.mubr.msk.f32.vlgmr.msra.gmra.mxu0 %vm53_vm2, %v50_v2  ;;  %s139_s26 = sshll.u32 %s255_s0, 4  ;;  %s140_s26 = int_to_ptr.vmem [resolvable:$true] %s139_s26 }
  0x28   :  { %s224_s2 = scalar_lea.vmem %s140_s26, 64  ;;  %p229_p2 = scmp.lt.s32.totalorder %s140_s26, %s140_s26 }
  0x29   :  { %p225_p1 = scmp.ne.s32.totalorder %s140_s26, %s224_s2  ;;  %p230_p3 = scmp.lt.s32.totalorder %s224_s2, %s224_s2 }
  0x2b   :  { %p231_p4 = por %p230_p3, %p229_p2 }
  0x2d   :  { %p232_p5 = pnand %p231_p4, %p225_p1 }
  0xe7   :  { %v127_v4 = vpop.f32.mrf.mxu0 }
  0xe8   :  { %v128_v5 = vadd.f32 %v127_v4, %v52_v3 }
  0xe9   :  { %v157_v6 = vpop.f32.mrf.mxu0 }
  0xea   :  { %132 = vst.msk [vmem:[#allocation8] sm:$0x7] %vm131_vm3, %v128_v5 }
  0xeb   :  { %235 = shalt.err (!%p232_p5)
}
  0xec   :  { %142 = dma.vmem_to_hbm [thread:$0]  %s140_s26, 64, %s291_s3, [#allocation4]  }
  0xed   :  { %248 = dma.done.wait [#allocation4], 64  }
  0xee   :  { %249 = vsyncadd [#allocation4], 4294967232 }
  0xef   :  { %146 = vsyncpa [#allocation3], 1 }
  0xf0   :  { %147 = vsyncpa [#allocation6], 1 }
  0xf1   :  { %148 = vsyncpa [#allocation4], 1 }

</bundles_post_ra>
